<compile_context>
chip_gen: v5e
topology: v5e:2x2
jax: 0.10.0
libtpu: 0.0.40
codegen_flags: <defaults>
</compile_context>

<pallas_src>
import functools

import jax
import jax.numpy as jnp
from jax.experimental import pallas as pl
from jax.experimental.pallas import tpu as pltpu


def _round_up(v, m):
    return ((v + m - 1) // m) * m


def _cdiv(a, b):
    return (a + b - 1) // b


def _softmax_linear_kernel(x_ref, w_ref, b_ref, o_ref, acc_ref, *, tk, w_slice):
    # x_ref  : [TB, TK] bf16
    # w_ref  : [D, 2] bf16 (resident) or [TK, 2] bf16 (streamed)
    # b_ref  : [2] f32 in SMEM
    # o_ref  : [TB, 2] f32
    # acc_ref: [TB, 2] f32 scratch, resident across the K (reduction) axis.
    k = pl.program_id(1)

    @pl.when(k == 0)
    def _init():
        acc_ref[...] = jnp.zeros_like(acc_ref)

    if w_slice:
        # Resident W^T: slice the current K chunk out of the full VMEM copy.
        w_tile = w_ref[pl.ds(pl.multiple_of(k * tk, 128), tk), :]
    else:
        w_tile = w_ref[...]

    # bf16 x bf16 -> f32 accumulation on the MXU.
    acc_ref[...] += jnp.dot(x_ref[...], w_tile,
                            preferred_element_type=jnp.float32)

    @pl.when(k == pl.num_programs(1) - 1)
    def _finalize():
        z = acc_ref[...]                                    # [TB, 2] f32 logits
        # Bias only enters through the logit difference; read it from SMEM.
        d = (z[:, 1:2] - z[:, 0:1]) + (b_ref[1] - b_ref[0])
        # Numerically stable 2-class softmax: p1 = sigmoid(d), p0 = 1 - p1.
        t = jnp.exp(-jnp.abs(d))
        s = 1.0 / (1.0 + t)
        p1 = jnp.where(d >= 0, s, 1.0 - s)
        # Two direct column stores — no concatenate / cross-lane shuffle.
        o_ref[:, 0:1] = (1.0 - p1).astype(o_ref.dtype)
        o_ref[:, 1:2] = p1.astype(o_ref.dtype)


def _pick_tk(D, target):
    """Pick the K tile size, preferring no padding copy of x columns."""
    if D % 128 == 0:
        t = max(128, min((target // 128) * 128, D))
        for cand in range(t, 127, -128):
            if D % cand == 0:
                return cand, D                 # exact divisor: no padding
        return 128, D                          # unreachable (128 divides D)
    if D <= target:
        return D, D                            # one full-D block (== array dim)
    # TODO(synk): D > target and not a multiple of 128 — fall back to padding
    # the feature axis (costs one extra copy of x through HBM).
    tkp = max(128, (target // 128) * 128)
    return tkp, _round_up(D, tkp)


def softmax_model_forward(x_nchw, weight, bias, *, tb=512, tk=8192):
    """Equivalent of SoftmaxModel.forward.

    x_nchw : [B, C, H, W] float
    weight : [2, D] float32   (nn.Linear(size_of_image, 2).weight)
    bias   : [2]    float32
    returns: [B, 2] float32 softmax probabilities
    """
    B = x_nchw.shape[0]
    D = weight.shape[1]

    # Flatten exactly like x.view(-1, size_of_image). Stream x and W^T in
    # bf16 (half HBM bytes for x, half MXU passes); accumulate in f32. If the
    # caller already supplies bf16 activations no cast happens.
    x2d = x_nchw.reshape(B, D)
    if x2d.dtype != jnp.bfloat16:
        x2d = x2d.astype(jnp.bfloat16)
    w_t = weight.T.astype(jnp.bfloat16)              # [D, 2]
    b1d = bias.reshape(2).astype(jnp.float32)        # [2] -> SMEM

    # ---- K (feature) tiling: avoid any jnp.pad copy of x when possible. ----
    TK, D_pad = _pick_tk(D, tk)
    if D_pad != D:
        x2d = jnp.pad(x2d, ((0, 0), (0, D_pad - D)))
        w_t = jnp.pad(w_t, ((0, D_pad - D), (0, 0)))
    KG = D_pad // TK

    # ---- Batch tiling: cdiv grid, no zero-padding of x rows. The trailing
    # partial tile reads undefined rows that only affect output rows >= B,
    # whose writes are dropped. ----
    TB = min(tb, _round_up(B, 8))
    if B > 8 and _cdiv(B, TB) == 1:
        # Guarantee >= 2 batch tiles so the "parallel" axis can shard across
        # both TensorCores on a 2-TC chip (v7x).
        TB = _round_up(_cdiv(B, 2), 8)

    # ---- Generation-aware VMEM budget (assume the smallest, v7x's 64 MiB,
    # if the query fails). Account for lane padding of the skinny buffers. ----
    try:
        vmem_cap = int(pltpu.get_tpu_info().vmem_capacity_bytes)
    except Exception:
        vmem_cap = 64 << 20
    vmem_budget = min((vmem_cap * 3) // 4, 96 << 20)

    w_resident_bytes = 2 * _round_up(D_pad, 16) * 128 * 2   # 2 bufs, bf16, lane-padded
    w_resident = w_resident_bytes <= (8 << 20)
    w_stream_bytes = 2 * _round_up(TK, 16) * 128 * 2

    def vmem_need(tb_, n_x_bufs):
        x_bytes = n_x_bufs * tb_ * TK * 2                   # bf16 x tiles
        w_bytes = w_resident_bytes if w_resident else w_stream_bytes
        o_bytes = 2 * tb_ * 128 * 4                         # lane-padded f32 out
        a_bytes = tb_ * 128 * 4                             # accumulator scratch
        return x_bytes + w_bytes + o_bytes + a_bytes

    while vmem_need(TB, 2) > vmem_budget and TB > 8:
        TB = max(8, _round_up(TB // 2, 8))
    BG = _cdiv(B, TB)

    # Deeper x pipelining only pays when tiles are small and the grid is long
    # (mostly a v7x concern: tiny tiles arrive faster than per-step overhead).
    deep_x = (TB * TK * 2) <= (2 << 20) and BG * KG >= 4 \
        and vmem_need(TB, 3) <= vmem_budget

    x_index = lambda i, k: (i, k)
    x_spec = None
    if deep_x and hasattr(pl, "Buffered"):
        try:
            x_spec = pl.BlockSpec((TB, TK), x_index,
                                  pipeline_mode=pl.Buffered(3))
        except TypeError:
            x_spec = None
    if x_spec is None:
        x_spec = pl.BlockSpec((TB, TK), x_index)

    if w_resident:
        # Fetched once and kept resident (constant block index); sliced per
        # K step inside the kernel.
        w_spec = pl.BlockSpec((D_pad, 2), lambda i, k: (0, 0))
    else:
        w_spec = pl.BlockSpec((TK, 2), lambda i, k: (k, 0))

    b_spec = pl.BlockSpec(memory_space=pltpu.MemorySpace.SMEM)
    out_spec = pl.BlockSpec((TB, 2), lambda i, k: (i, 0))

    kernel = functools.partial(_softmax_linear_kernel, tk=TK,
                               w_slice=(w_resident and KG > 1))

    cost = pl.CostEstimate(
        flops=4 * B * D,                # 2 classes x (2*B*D MAC flops)
        transcendentals=B,              # one exp per row in the epilogue
        bytes_accessed=B * D * 2 + D * 2 * 2 + 2 * 4 + B * 2 * 4,
    )

    out = pl.pallas_call(
        kernel,
        out_shape=jax.ShapeDtypeStruct((B, 2), jnp.float32),
        grid_spec=pltpu.PrefetchScalarGridSpec(
            num_scalar_prefetch=0,
            grid=(BG, KG),
            in_specs=[x_spec, w_spec, b_spec],
            out_specs=out_spec,
            scratch_shapes=[pltpu.VMEM((TB, 2), jnp.float32)],
        ),
        compiler_params=pltpu.CompilerParams(
            dimension_semantics=("parallel", "arbitrary"),
            vmem_limit_bytes=int(vmem_budget),
        ),
        cost_estimate=cost,
    )(x2d, w_t, b1d)

    return out


if __name__ == "__main__":
    # Small shapes consistent with the module: [B, C, H, W] images flattened
    # to size_of_image = C*H*W features.
    B, C, H, W = 2, 4, 16, 16
    size_of_image = C * H * W  # 1024

    key = jax.random.PRNGKey(0)
    kx, kw, kb = jax.random.split(key, 3)

    x = jax.random.normal(kx, (B, C, H, W), dtype=jnp.float32)

    # Deterministic parameter init mimicking nn.Linear's U(-1/sqrt(in), 1/sqrt(in)).
    bound = 1.0 / jnp.sqrt(jnp.float32(size_of_image))
    weight = jax.random.uniform(kw, (2, size_of_image), dtype=jnp.float32,
                                minval=-bound, maxval=bound)
    bias = jax.random.uniform(kb, (2,), dtype=jnp.float32,
                              minval=-bound, maxval=bound)

    out = softmax_model_forward(x, weight, bias)
    out = jax.block_until_ready(out)

    # Reference in plain JAX (f32). Tolerance covers the bf16 cast of x / W
    # used for the MXU dot (accumulation stays f32).
    ref = jax.nn.softmax(x.reshape(B, -1) @ weight.T + bias, axis=1)
    assert out.shape == (B, 2)
    assert jnp.allclose(out, ref, atol=1e-2, rtol=1e-2)
    assert jnp.allclose(jnp.sum(out, axis=1), 1.0, atol=1e-5)

    print("KERNEL_OK")
</pallas_src>

<mosaic_0001>
module attributes {stable_mosaic.version = 11 : i64} {
  func.func @_softmax_linear_kernel(%arg0: i32, %arg1: i32, %arg2: memref<8x1024xbf16, #tpu.memory_space<vmem>>, %arg3: memref<1024x2xbf16, #tpu.memory_space<vmem>>, %arg4: memref<2xf32, #tpu.memory_space<smem>>, %arg5: memref<8x2xf32, #tpu.memory_space<vmem>>, %arg6: memref<8x2xf32, #tpu.memory_space<vmem>>) attributes {dimension_semantics = [#tpu.dimension_semantics<parallel>, #tpu.dimension_semantics<arbitrary>], iteration_bounds = array<i64: 1, 1>, scalar_prefetch = 0 : i64, scratch_operands = 1 : i64, tpu.core_type = #tpu.core_type<tc>, window_params = [{transform_indices = @transform_0, window_bounds = array<i64: 8, 1024>}, {pipeline_mode = #tpu.pipeline_mode<synchronous>, transform_indices = @transform_1, window_bounds = array<i64: 1024, 2>}, {transform_indices = @transform_2, window_bounds = array<i64: 2>}, {transform_indices = @transform_3, window_bounds = array<i64: 8, 2>}]} {
    %c0_i32 = arith.constant 0 : i32
    %0 = arith.cmpi eq, %arg1, %c0_i32 : i32
    %1 = arith.extui %0 : i1 to i32
    %c0_i32_0 = arith.constant 0 : i32
    %2 = arith.cmpi ne, %1, %c0_i32_0 : i32
    scf.if %2 {
      %cst_10 = arith.constant 0.000000e+00 : f32
      %12 = vector.broadcast %cst_10 : f32 to vector<8x2xf32>
      %c0_11 = arith.constant 0 : index
      %c0_12 = arith.constant 0 : index
      %13 = vector.load %arg6[%c0_11, %c0_12] : memref<8x2xf32, #tpu.memory_space<vmem>>, vector<8x2xf32>
      tpu.vector_store %arg6[%c0_11, %c0_12], %12 {strides = array<i32>} : memref<8x2xf32, #tpu.memory_space<vmem>>, vector<8x2xf32>,
    } else {
    }
    %c0 = arith.constant 0 : index
    %c0_1 = arith.constant 0 : index
    %3 = vector.load %arg3[%c0, %c0_1] : memref<1024x2xbf16, #tpu.memory_space<vmem>>, vector<1024x2xbf16>
    %c0_2 = arith.constant 0 : index
    %c0_3 = arith.constant 0 : index
    %4 = vector.load %arg6[%c0_2, %c0_3] : memref<8x2xf32, #tpu.memory_space<vmem>>, vector<8x2xf32>
    %c0_4 = arith.constant 0 : index
    %c0_5 = arith.constant 0 : index
    %5 = vector.load %arg2[%c0_4, %c0_5] : memref<8x1024xbf16, #tpu.memory_space<vmem>>, vector<8x1024xbf16>
    %cst = arith.constant dense<0.000000e+00> : vector<8x2xf32>
    %6 = tpu.matmul %5, %3, %cst {dimension_numbers = #tpu.dot_dimension_numbers<[1], [0], [0], [1], [0, 0, 1, 1], [], []>} : vector<8x1024xbf16>, vector<1024x2xbf16>, vector<8x2xf32> -> vector<8x2xf32>
    %7 = arith.addf %4, %6 : vector<8x2xf32>
    %c0_6 = arith.constant 0 : index
    %c0_7 = arith.constant 0 : index
    %8 = vector.load %arg6[%c0_6, %c0_7] : memref<8x2xf32, #tpu.memory_space<vmem>>, vector<8x2xf32>
    tpu.vector_store %arg6[%c0_6, %c0_7], %7 {strides = array<i32>} : memref<8x2xf32, #tpu.memory_space<vmem>>, vector<8x2xf32>,
    %c0_i32_8 = arith.constant 0 : i32
    %9 = arith.cmpi eq, %arg1, %c0_i32_8 : i32
    %10 = arith.extui %9 : i1 to i32
    %c0_i32_9 = arith.constant 0 : i32
    %11 = arith.cmpi ne, %10, %c0_i32_9 : i32
    scf.if %11 {
      %c0_10 = arith.constant 0 : index
      %c0_11 = arith.constant 0 : index
      %12 = vector.load %arg6[%c0_10, %c0_11] : memref<8x2xf32, #tpu.memory_space<vmem>>, vector<8x2xf32>
      %13 = vector.extract_strided_slice %12 {offsets = [0, 1], sizes = [8, 1], strides = [1, 1]} : vector<8x2xf32> to vector<8x1xf32>
      %14 = vector.extract_strided_slice %12 {offsets = [0, 0], sizes = [8, 1], strides = [1, 1]} : vector<8x2xf32> to vector<8x1xf32>
      %15 = arith.subf %13, %14 : vector<8x1xf32>
      %c1 = arith.constant 1 : index
      %16 = memref.load %arg4[%c1] : memref<2xf32, #tpu.memory_space<smem>>
      %c0_12 = arith.constant 0 : index
      %17 = memref.load %arg4[%c0_12] : memref<2xf32, #tpu.memory_space<smem>>
      %18 = arith.subf %16, %17 : f32
      %19 = vector.broadcast %18 : f32 to vector<8x1xf32>
      %20 = arith.addf %15, %19 : vector<8x1xf32>
      %21 = math.absf %20 : vector<8x1xf32>
      %cst_13 = arith.constant 0.000000e+00 : f32
      %22 = vector.broadcast %cst_13 : f32 to vector<8x1xf32>
      %23 = arith.subf %22, %21 : vector<8x1xf32>
      %24 = math.exp %23 : vector<8x1xf32>
      %cst_14 = arith.constant 1.000000e+00 : f32
      %25 = vector.broadcast %cst_14 : f32 to vector<8x1xf32>
      %26 = arith.addf %25, %24 : vector<8x1xf32>
      %cst_15 = arith.constant 1.000000e+00 : f32
      %27 = vector.broadcast %cst_15 : f32 to vector<8x1xf32>
      %28 = arith.divf %27, %26 : vector<8x1xf32>
      %cst_16 = arith.constant 0.000000e+00 : f32
      %29 = vector.broadcast %cst_16 : f32 to vector<8x1xf32>
      %30 = arith.cmpf oge, %20, %29 : vector<8x1xf32>
      %cst_17 = arith.constant 1.000000e+00 : f32
      %31 = vector.broadcast %cst_17 : f32 to vector<8x1xf32>
      %32 = arith.subf %31, %28 : vector<8x1xf32>
      %33 = arith.select %30, %28, %32 : vector<8x1xi1>, vector<8x1xf32>
      %cst_18 = arith.constant 1.000000e+00 : f32
      %34 = vector.broadcast %cst_18 : f32 to vector<8x1xf32>
      %35 = arith.subf %34, %33 : vector<8x1xf32>
      %c0_19 = arith.constant 0 : index
      %c0_20 = arith.constant 0 : index
      %36 = vector.load %arg5[%c0_19, %c0_20] : memref<8x2xf32, #tpu.memory_space<vmem>>, vector<8x1xf32>
      tpu.vector_store %arg5[%c0_19, %c0_20], %35 {strides = array<i32>} : memref<8x2xf32, #tpu.memory_space<vmem>>, vector<8x1xf32>,
      %c0_21 = arith.constant 0 : index
      %c1_22 = arith.constant 1 : index
      %37 = vector.load %arg5[%c0_21, %c1_22] : memref<8x2xf32, #tpu.memory_space<vmem>>, vector<8x1xf32>
      tpu.vector_store %arg5[%c0_21, %c1_22], %33 {strides = array<i32>} : memref<8x2xf32, #tpu.memory_space<vmem>>, vector<8x1xf32>,
    } else {
    }
    return
  }
  func.func @transform_0(%arg0: i32, %arg1: i32) -> (i32, i32) {
    %c0_i32 = arith.constant 0 : i32
    return %arg0, %arg1 : i32, i32
  }
  func.func @transform_1(%arg0: i32, %arg1: i32) -> (i32, i32) {
    %c0_i32 = arith.constant 0 : i32
    %c0_i32_0 = arith.constant 0 : i32
    %c0_i32_1 = arith.constant 0 : i32
    return %c0_i32, %c0_i32_0 : i32, i32
  }
  func.func @transform_2(%arg0: i32, %arg1: i32) -> i32 {
    %c0_i32 = arith.constant 0 : i32
    %c0_i32_0 = arith.constant 0 : i32
    return %c0_i32 : i32
  }
  func.func @transform_3(%arg0: i32, %arg1: i32) -> (i32, i32) {
    %c0_i32 = arith.constant 0 : i32
    %c0_i32_0 = arith.constant 0 : i32
    return %arg0, %c0_i32 : i32, i32
  }
}

</mosaic_0001>

<bundles_post_ra>
// kernel: tpu_custom_call.1
= control target key start
LH: loop header
LB: loop body
LE: loop exit
PB: predicated region body
PF: predicated region fallthrough
CT: control target
= control target key end

     0   :  { %8 = vsyncpa [#allocation5], 0  ;;  %s1361_s0 = inlined_call_operand.vmem [shape: bf16[2,1024], index: 0, kind: input, shape index: {}]   ;;  %s1362_s1 = inlined_call_operand.vmem [shape: bf16[1024,2], index: 1, kind: input, shape index: {}]   ;;  %s1363_s2 = inlined_call_operand.vmem [shape: f32[2], index: 2, kind: input, shape index: {}]   ;;  %s1364_s3 = inlined_call_operand.hbm [shape: f32[2,2], index: 3, kind: output, shape index: {}]  }
   0x1   :  { %9 = vsyncpa [#allocation4], 0  ;;  %s19_s14 = sshll.u32 %s1363_s2, 4  ;;  %s1122_s15 = smov [#allocation3]   ;;  %s20_s14 = int_to_ptr.vmem [resolvable:$true] %s19_s14 }
   0x2   :  { %22 = dma.vmem_to_smem %s20_s14, 16, %s1122_s15, [#allocation5]  }
   0x3   :  { %1118 = dma.done.wait [#allocation5], 16  }
   0x4   :  { %1119 = vsyncadd [#allocation5], 4294967280 }
   0x5   :  { %27 = sfence }
   0x6   :  { %v1014_v0 = vld [vmem:[%s1362_s1 + $0x38] sm:$0xff]  ;;  %v1013_v4 = vld [vmem:[%s1362_s1 + $0x30] sm:$0xff]  ;;  %v1012_v8 = vld [vmem:[%s1362_s1 + $0x28] sm:$0xff]  ;;  %vm32_vm0 = vcmask 15360   ;;  %s1006_s9 = sld [smem:[#allocation3 + $0x1]]  ;;  %s1125_s11 = smov 127  }
   0x7   :  { %v1022_v1 = vld [vmem:[%s1362_s1 + $0x78] sm:$0xff]  ;;  %578 = vmatpush.bf16.msra.mxu0 %v1014_v0  ;;  %v1021_v5 = vld [vmem:[%s1362_s1 + $0x70] sm:$0xff]  ;;  %v1020_v9 = vld [vmem:[%s1362_s1 + $0x68] sm:$0xff]  ;;  %vm727_vm6 = vcmask 7168   ;;  %vm729_vm7 = vcmask 15368  }
   0x8   :  { %v1030_v2 = vld [vmem:[%s1362_s1 + $0xb8] sm:$0xff]  ;;  %591 = vmatpush.bf16.msra.mxu1 %v1022_v1  ;;  %v1029_v6 = vld [vmem:[%s1362_s1 + $0xb0] sm:$0xff]  ;;  %v1028_v10 = vld [vmem:[%s1362_s1 + $0xa8] sm:$0xff] }
   0x9   :  { %v1038_v3 = vld [vmem:[%s1362_s1 + $0xf8] sm:$0xff]  ;;  %604 = vmatpush.bf16.msra.mxu2 %v1030_v2  ;;  %v1037_v7 = vld [vmem:[%s1362_s1 + $0xf0] sm:$0xff]  ;;  %v1036_v11 = vld [vmem:[%s1362_s1 + $0xe8] sm:$0xff] }
   0xa   :  { %617 = vmatpush.bf16.msra.mxu3 %v1038_v3  ;;  %v1011_v12 = vld [vmem:[%s1362_s1 + $0x20] sm:$0xff]  ;;  %v1010_v16 = vld [vmem:[%s1362_s1 + $0x18] sm:$0xff]  ;;  %v164_v18 = vld [vmem:[%s1361_s0 + $0x8] sm:$0xff] }
   0xb   :  { %579 = vmatpush.bf16.msra.mxu0 %v1013_v4  ;;  %v1019_v13 = vld [vmem:[%s1362_s1 + $0x60] sm:$0xff]  ;;  %v1018_v19 = vld [vmem:[%s1362_s1 + $0x58] sm:$0xff]  ;;  %v165_v20 = vld [vmem:[%s1361_s0 + $0x10] sm:$0xff]  ;;  %171 = vst [vmem:[#allocation1 + $0x1] ss:$9 sm:$0xff] %v164_v18 }
   0xc   :  { %592 = vmatpush.bf16.msra.mxu1 %v1021_v5  ;;  %v1027_v14 = vld [vmem:[%s1362_s1 + $0xa0] sm:$0xff]  ;;  %v166_v21 = vld [vmem:[%s1361_s0 + $0x18] sm:$0xff]  ;;  %174 = vst [vmem:[#allocation1 + $0x2] ss:$9 sm:$0xff] %v165_v20  ;;  %v1009_v24 = vld [vmem:[%s1362_s1 + $0x10] sm:$0xff] }
   0xd   :  { %605 = vmatpush.bf16.msra.mxu2 %v1029_v6  ;;  %v1035_v15 = vld [vmem:[%s1362_s1 + $0xe0] sm:$0xff]  ;;  %v1026_v22 = vld [vmem:[%s1362_s1 + $0x98] sm:$0xff]  ;;  %177 = vst [vmem:[#allocation1 + $0x3] ss:$9 sm:$0xff] %v166_v21  ;;  %v1017_v25 = vld [vmem:[%s1362_s1 + $0x50] sm:$0xff] }
   0xe   :  { %618 = vmatpush.bf16.msra.mxu3 %v1037_v7  ;;  %v163_v17 = vld [vmem:[%s1361_s0] sm:$0xff]  ;;  %v1034_v23 = vld [vmem:[%s1362_s1 + $0xd8] sm:$0xff]  ;;  %v1025_v26 = vld [vmem:[%s1362_s1 + $0x90] sm:$0xff]  ;;  %s695_s0 = sld [smem:[#allocation3]] }
   0xf   :  { %580 = vmatpush.bf16.msra.mxu0 %v1012_v8  ;;  %168 = vst [vmem:[#allocation1] ss:$9 sm:$0xff] %v163_v17  ;;  %v1033_v27 = vld [vmem:[%s1362_s1 + $0xd0] sm:$0xff]  ;;  %v1008_v28 = vld [vmem:[%s1362_s1 + $0x8] sm:$0xff]  ;;  %v1007_v32 = vld [vmem:[%s1362_s1] sm:$0xff] }
  0x10   :  { %593 = vmatpush.bf16.msra.mxu1 %v1020_v9  ;;  %v1016_v29 = vld [vmem:[%s1362_s1 + $0x48] sm:$0xff]  ;;  %v1015_v33 = vld [vmem:[%s1362_s1 + $0x40] sm:$0xff]  ;;  %v1046_v36 = vld [vmem:[%s1362_s1 + $0x138] sm:$0xff] }
  0x11   :  { %606 = vmatpush.bf16.msra.mxu2 %v1028_v10  ;;  %v1024_v30 = vld [vmem:[%s1362_s1 + $0x88] sm:$0xff]  ;;  %v1023_v34 = vld [vmem:[%s1362_s1 + $0x80] sm:$0xff]  ;;  %v1054_v37 = vld [vmem:[%s1362_s1 + $0x178] sm:$0xff] }
  0x12   :  { %619 = vmatpush.bf16.msra.mxu3 %v1036_v11  ;;  %v1032_v31 = vld [vmem:[%s1362_s1 + $0xc8] sm:$0xff]  ;;  %v1031_v35 = vld [vmem:[%s1362_s1 + $0xc0] sm:$0xff]  ;;  %v1062_v38 = vld [vmem:[%s1362_s1 + $0x1b8] sm:$0xff] }
  0x13   :  { %581 = vmatpush.bf16.msra.mxu0 %v1011_v12  ;;  %v1070_v39 = vld [vmem:[%s1362_s1 + $0x1f8] sm:$0xff]  ;;  %v1045_v40 = vld [vmem:[%s1362_s1 + $0x130] sm:$0xff]  ;;  %v1044_v48 = vld [vmem:[%s1362_s1 + $0x128] sm:$0xff] }
  0x14   :  { %594 = vmatpush.bf16.msra.mxu1 %v1019_v13  ;;  %v1053_v43 = vld [vmem:[%s1362_s1 + $0x170] sm:$0xff]  ;;  %v1052_v49 = vld [vmem:[%s1362_s1 + $0x168] sm:$0xff]  ;;  %v1043_v52 = vld [vmem:[%s1362_s1 + $0x120] sm:$0xff]  ;;  %s696_s10 = ssub.f32 %s1006_s9, %s695_s0 }
  0x15   :  { %607 = vmatpush.bf16.msra.mxu2 %v1027_v14  ;;  %v1061_v46 = vld [vmem:[%s1362_s1 + $0x1b0] sm:$0xff]  ;;  %v1060_v50 = vld [vmem:[%s1362_s1 + $0x1a8] sm:$0xff]  ;;  %v1051_v53 = vld [vmem:[%s1362_s1 + $0x160] sm:$0xff]  ;;  %v1123_v14 = vmov 0.0  }
  0x16   :  { %620 = vmatpush.bf16.msra.mxu3 %v1035_v15  ;;  %v180_v41 = vld [vmem:[#allocation1 + $0x12] sm:$0xff]  ;;  %v178_v42 = vld [vmem:[#allocation1] sm:$0xff]  ;;  %v179_v45 = vld [vmem:[#allocation1 + $0x9] sm:$0xff]  ;;  %33 = vst.msk [vmem:[#allocation2] sm:$0xff] %vm32_vm0, %v1123_v14 }
  0x17   :  { %582 = vmatpush.bf16.msra.mxu0 %v1010_v16  ;;  %v181_v44 = vld [vmem:[#allocation1 + $0x1b] sm:$0xff]  ;;  %v1069_v47 = vld [vmem:[%s1362_s1 + $0x1f0] sm:$0xff]  ;;  %v1068_v51 = vld [vmem:[%s1362_s1 + $0x1e8] sm:$0xff] }
  0x18   :  { %595 = vmatpush.bf16.msra.mxu1 %v1018_v19  ;;  %v1059_v54 = vld [vmem:[%s1362_s1 + $0x1a0] sm:$0xff]  ;;  %v1042_v56 = vld [vmem:[%s1362_s1 + $0x118] sm:$0xff]  ;;  %v1041_v60 = vld [vmem:[%s1362_s1 + $0x110] sm:$0xff] }
  0x19   :  { %608 = vmatpush.bf16.msra.mxu2 %v1026_v22  ;;  %v1067_v55 = vld [vmem:[%s1362_s1 + $0x1e0] sm:$0xff]  ;;  %v1050_v57 = vld [vmem:[%s1362_s1 + $0x158] sm:$0xff]  ;;  %v1049_v61 = vld [vmem:[%s1362_s1 + $0x150] sm:$0xff] }
  0x1a   :  { %621 = vmatpush.bf16.msra.mxu3 %v1034_v23  ;;  %v1058_v58 = vld [vmem:[%s1362_s1 + $0x198] sm:$0xff]  ;;  %v1057_v62 = vld [vmem:[%s1362_s1 + $0x190] sm:$0xff]  ;;  %v1040_v0 = vld [vmem:[%s1362_s1 + $0x108] sm:$0xff] }
  0x1b   :  { %583 = vmatpush.bf16.msra.mxu0 %v1009_v24  ;;  %v1066_v59 = vld [vmem:[%s1362_s1 + $0x1d8] sm:$0xff]  ;;  %v1065_v63 = vld [vmem:[%s1362_s1 + $0x1d0] sm:$0xff]  ;;  %v1048_v1 = vld [vmem:[%s1362_s1 + $0x148] sm:$0xff] }
  0x1c   :  { %596 = vmatpush.bf16.msra.mxu1 %v1017_v25  ;;  %v1056_v2 = vld [vmem:[%s1362_s1 + $0x188] sm:$0xff]  ;;  %v1039_v4 = vld [vmem:[%s1362_s1 + $0x100] sm:$0xff]  ;;  %v184_v10 = vld [vmem:[#allocation1 + $0x36] sm:$0xff] }
  0x1d   :  { %609 = vmatpush.bf16.msra.mxu2 %v1025_v26  ;;  %v1064_v3 = vld [vmem:[%s1362_s1 + $0x1c8] sm:$0xff]  ;;  %v1047_v5 = vld [vmem:[%s1362_s1 + $0x140] sm:$0xff] }
  0x1e   :  { %622 = vmatpush.bf16.msra.mxu3 %v1033_v27  ;;  %v1055_v6 = vld [vmem:[%s1362_s1 + $0x180] sm:$0xff]  ;;  %v183_v9 = vld [vmem:[#allocation1 + $0x2d] sm:$0xff] }
  0x1f   :  { %584 = vmatpush.bf16.msra.mxu0 %v1008_v28  ;;  %v1063_v7 = vld [vmem:[%s1362_s1 + $0x1c0] sm:$0xff]  ;;  %s1124_s1 = smov 1  }
  0x20   :  { %597 = vmatpush.bf16.msra.mxu1 %v1016_v29  ;;  %v182_v8 = vld [vmem:[#allocation1 + $0x24] sm:$0xff] }
  0x21   :  { %610 = vmatpush.bf16.msra.mxu2 %v1024_v30  ;;  %v185_v11 = vld [vmem:[#allocation1 + $0x3f] sm:$0xff] }
  0x22   :  { %623 = vmatpush.bf16.msra.mxu3 %v1032_v31 }
  0x23   :  { %585 = vmatpush.bf16.msra.mxu0 %v1007_v32 }
  0x24   :  { %598 = vmatpush.bf16.msra.mxu1 %v1015_v33  ;;  %v162_v33 = vld [vmem:[#allocation2] sm:$0xff] }
  0x25   :  { %611 = vmatpush.bf16.msra.mxu2 %v1023_v34 }
  0x26   :  { %624 = vmatpush.bf16.msra.mxu3 %v1031_v35  ;;  %586 = vmatmul.bf16.vlgmr.msra.gmra.mxu0 %v178_v42 }
  0x27   :  { %630 = vmatpush.bf16.msrb.mxu0 %v1046_v36  ;;  %599 = vmatmul.bf16.vlgmr.msra.gmra.mxu1 %v179_v45 }
  0x28   :  { %643 = vmatpush.bf16.msrb.mxu1 %v1054_v37  ;;  %612 = vmatmul.bf16.vlgmr.msra.gmra.mxu2 %v180_v41 }
  0x29   :  { %656 = vmatpush.bf16.msrb.mxu2 %v1062_v38  ;;  %625 = vmatmul.bf16.vlgmr.msra.gmra.mxu3 %v181_v44 }
  0x2a   :  { %669 = vmatpush.bf16.msrb.mxu3 %v1070_v39  ;;  %v697_v39 = vstv %s696_s10 }
  0x2b   :  { %631 = vmatpush.bf16.msrb.mxu0 %v1045_v40 }
  0x2c   :  { %644 = vmatpush.bf16.msrb.mxu1 %v1053_v43 }
  0x2d   :  { %657 = vmatpush.bf16.msrb.mxu2 %v1061_v46 }
  0x2e   :  { %670 = vmatpush.bf16.msrb.mxu3 %v1069_v47 }
  0x2f   :  { %632 = vmatpush.bf16.msrb.mxu0 %v1044_v48 }
  0x30   :  { %645 = vmatpush.bf16.msrb.mxu1 %v1052_v49 }
  0x31   :  { %658 = vmatpush.bf16.msrb.mxu2 %v1060_v50 }
  0x32   :  { %671 = vmatpush.bf16.msrb.mxu3 %v1068_v51 }
  0x33   :  { %633 = vmatpush.bf16.msrb.mxu0 %v1043_v52 }
  0x34   :  { %646 = vmatpush.bf16.msrb.mxu1 %v1051_v53 }
  0x35   :  { %659 = vmatpush.bf16.msrb.mxu2 %v1059_v54 }
  0x36   :  { %672 = vmatpush.bf16.msrb.mxu3 %v1067_v55 }
  0x37   :  { %634 = vmatpush.bf16.msrb.mxu0 %v1042_v56 }
  0x38   :  { %647 = vmatpush.bf16.msrb.mxu1 %v1050_v57 }
  0x39   :  { %660 = vmatpush.bf16.msrb.mxu2 %v1058_v58 }
  0x3a   :  { %673 = vmatpush.bf16.msrb.mxu3 %v1066_v59 }
  0x3b   :  { %635 = vmatpush.bf16.msrb.mxu0 %v1041_v60 }
  0x3c   :  { %648 = vmatpush.bf16.msrb.mxu1 %v1049_v61 }
  0x3d   :  { %661 = vmatpush.bf16.msrb.mxu2 %v1057_v62 }
  0x3e   :  { %674 = vmatpush.bf16.msrb.mxu3 %v1065_v63 }
  0x3f   :  { %636 = vmatpush.bf16.msrb.mxu0 %v1040_v0 }
  0x40   :  { %649 = vmatpush.bf16.msrb.mxu1 %v1048_v1 }
  0x41   :  { %662 = vmatpush.bf16.msrb.mxu2 %v1056_v2 }
  0x42   :  { %675 = vmatpush.bf16.msrb.mxu3 %v1064_v3 }
  0x43   :  { %637 = vmatpush.bf16.msrb.mxu0 %v1039_v4 }
  0x44   :  { %650 = vmatpush.bf16.msrb.mxu1 %v1047_v5 }
  0x45   :  { %663 = vmatpush.bf16.msrb.mxu2 %v1055_v6 }
  0x46   :  { %676 = vmatpush.bf16.msrb.mxu3 %v1063_v7  ;;  %638 = vmatmul.bf16.vlgmr.msrb.gmra.mxu0 %v182_v8 }
  0x47   :  { %651 = vmatmul.bf16.vlgmr.msrb.gmra.mxu1 %v183_v9 }
  0x48   :  { %664 = vmatmul.bf16.vlgmr.msrb.gmra.mxu2 %v184_v10 }
  0x49   :  { %677 = vmatmul.bf16.vlgmr.msrb.gmra.mxu3 %v185_v11 }
  0xa3   :  { %v587_v12 = vpop.f32.mrf.mxu0 }
  0xa4   :  { %v600_v13 = vpop.f32.mrf.mxu1 }
  0xa5   :  { %v601_v21 = vadd.f32 %v600_v13, %v587_v12 }
  0xab   :  { %v613_v15 = vpop.f32.mrf.mxu2  ;;  %v589_v17 = vpop.f32.mrf.mxu0 }
  0xac   :  { %v626_v16 = vpop.f32.mrf.mxu3  ;;  %v602_v18 = vpop.f32.mrf.mxu1  ;;  %v614_v22 = vadd.f32 %v613_v15, %v601_v21 }
  0xae   :  { %v627_v23 = vadd.f32 %v626_v16, %v614_v22 }
  0xb3   :  { %v615_v19 = vpop.f32.mrf.mxu2 }
  0xb4   :  { %v628_v20 = vpop.f32.mrf.mxu3 }
  0xc3   :  { %v639_v24 = vpop.f32.mrf.mxu0 }
  0xc4   :  { %v652_v25 = vpop.f32.mrf.mxu1  ;;  %v640_v26 = vadd.f32 %v639_v24, %v627_v23 }
  0xc6   :  { %v653_v27 = vadd.f32 %v652_v25, %v640_v26 }
  0xcb   :  { %v665_v28 = vpop.f32.mrf.mxu2  ;;  %v641_v31 = vpop.f32.mrf.mxu0 }
  0xcc   :  { %v678_v29 = vpop.f32.mrf.mxu3  ;;  %v666_v30 = vadd.f32 %v665_v28, %v653_v27  ;;  %v654_v32 = vpop.f32.mrf.mxu1 }
  0xce   :  { %v679_v34 = vadd.f32 %v678_v29, %v666_v30 }
  0xd0   :  { %v682_v35 = vadd.f32 %v679_v34, %v162_v33 }
  0xd2   :  { %684 = vst.msk [vmem:[#allocation2] sm:$0xff] %vm32_vm0, %v682_v35 }
  0xd3   :  { %v667_v36 = vpop.f32.mrf.mxu2 }
  0xd4   :  { %v680_v37 = vpop.f32.mrf.mxu3 }
  0xd9   :  { %v688_v38 = vld [vmem:[#allocation2] sm:$0xff] }
  0xda   :  { %690 = vrot.lane.b32.xlu0 %v688_v38, %s1124_s1 }
 0x14c   :  { %v691_v40 = vpop.permute.xlu0 %690 }
 0x14d   :  { %v693_v41 = vsub.f32 %v688_v38, %v691_v40 }
 0x14f   :  { %v698_v42 = vadd.f32 %v697_v39, %v693_v41 }
 0x151   :  { %v699_v43 = vand.u32 2147483647, %v698_v42  ;;  %vm719_vm5 = vcmp.ge.f32.partialorder %v698_v42, 0.0 }
 0x153   :  { %v700_v44 = vsub.f32 0.0, %v699_v43 }
 0x155   :  { %v701_v45 = vmul.f32 1.442695, %v700_v44 }
 0x157   :  { %1078 = vpow2.f32 %v701_v45 }
 0x15d   :  { %v1079_v46 = vpop.eup %1078 }
 0x15e   :  { %v703_v47 = vadd.f32 1.0, %v1079_v46 }
 0x160   :  { %1080 = vrcp.f32 %v703_v47  ;;  %v715_v51 = vand.u32 2147483648, %v703_v47  ;;  %v713_v53 = vand.u32 2147483647, %v703_v47  ;;  %vm709_vm2 = vweird.f32 %v703_v47 }
 0x162   :  { %v716_v55 = vor.u32 1.1754944e-38, %v715_v51  ;;  %vm714_vm4 = vcmp.eq.f32.partialorder %v713_v53, 8.507059e+37 }
 0x166   :  { %v1081_v48 = vpop.eup %1080 }
 0x167   :  { %v705_v49 = vmul.f32 %v1081_v48, %v703_v47  ;;  %vm710_vm1 = vweird.f32 %v1081_v48 }
 0x168   :  { %vm711_vm3 = vmor %vm709_vm2, %vm710_vm1 }
 0x169   :  { %v706_v50 = vsub.f32 1.0, %v705_v49 }
 0x16b   :  { %v707_v52 = vmul.f32 %v1081_v48, %v706_v50 }
 0x16d   :  { %v708_v54 = vadd.f32 %v1081_v48, %v707_v52 }
 0x16f   :  { %v712_v56 = vsel %vm711_vm3, %v1081_v48, %v708_v54 }
 0x170   :  { %v717_v57 = vsel %vm714_vm4, %v716_v55, %v712_v56 }
 0x171   :  { %v720_v58 = vsub.f32 1.0, %v717_v57 }
 0x173   :  { %v721_v59 = vsel %vm719_vm5, %v717_v57, %v720_v58 }
 0x174   :  { %v722_v60 = vsub.f32 1.0, %v721_v59 }
 0x176   :  { %724 = vrot.lane.b32.xlu0 %v722_v60, %s1125_s11 }
 0x1e8   :  { %v725_v61 = vpop.permute.xlu0 %724 }
 0x1e9   :  { %728 = vst.msk [vmem:[#allocation6] sm:$0xff] %vm727_vm6, %v725_v61 }
 0x1ea   :  { %730 = vst.msk [vmem:[#allocation6] sm:$0xff] %vm729_vm7, %v721_v59 }
 0x1eb   :  { %734 = vsyncadd [#allocation4], 96  ;;  %s737_s14 = sshll.u32 %s1364_s3, 4  ;;  %s1126_s15 = smov [#allocation6]   ;;  %s738_s14 = int_to_ptr.hbm [resolvable:$true] %s737_s14 }
 0x1ec   :  { %s735_s16 = sshll.u32 %s1126_s15, 4  ;;  %s1127_s17 = smov 32   ;;  %s736_s16 = int_to_ptr.vmem [resolvable:$true] %s735_s16 }
 0x1ed   :  { %s1128_s18 = smov 2  }
 0x1ee   :  { %743 = dma.vmem_to_hbm [thread:$0]  %s736_s16, 32, %s738_s14, [#allocation4], %s1127_s17, %s1127_s17, %s1128_s18  }
 0x1ef   :  { %1120 = dma.done.wait [#allocation4], 128  }
 0x1f0   :  { %1121 = vsyncadd [#allocation4], 4294967168 }
 0x1f1   :  { %748 = vsyncpa [#allocation4], 1 }
 0x1f2   :  { %749 = vsyncpa [#allocation5], 1 }

</bundles_post_ra>
